<compile_context>
chip_gen: v7x
topology: tpu7x:2x2x1
jax: 0.10.0
libtpu: 0.0.40
codegen_flags: <defaults>
</compile_context>

<pallas_src>
import functools
import math

import jax
import jax.numpy as jnp
from jax import lax
from jax.experimental import pallas as pl
from jax.experimental.pallas import tpu as pltpu

_LANES = 128


def _round_up(x, m):
    return ((x + m - 1) // m) * m


def _nt_xent_lse_kernel(zr_ref, zc_ref, lse_ref, l_scr, *,
                        n_real, shift, block_m, block_k):
    """One (block_m, block_k) tile of the masked exp(sim) row-sum.

    zr_ref/zc_ref hold rows of zn * sqrt(1/T), so their dot product is already
    cos/T.  l_scr is a lane-wide (block_m, 128) f32 partial-sum accumulator; the
    single cross-lane reduction happens only on the last column block.
    """
    i = pl.program_id(0)      # row block (parallel)
    k = pl.program_id(1)      # col block (reduction axis, innermost)
    nk = pl.num_programs(1)

    @pl.when(k == 0)
    def _init():
        l_scr[...] = jnp.zeros_like(l_scr)

    # (block_m, block_k) similarity tile on the MXU: contract the feature dim of
    # both operands directly (no transpose), f32 accumulation.  No scratch
    # store/reload and no per-tile 1/T multiply (folded into the inputs).
    sim = lax.dot_general(
        zr_ref[...], zc_ref[...],
        dimension_numbers=(((1,), (1,)), ((), ())),
        preferred_element_type=jnp.float32,
    )
    if shift:
        e = jnp.exp(sim - shift)          # bounded by ~1 (cosine bound)
    else:
        e = jnp.exp(sim)                  # safe: exp(1.02/T)*N < f32 max

    def _accumulate(ev):
        # Lane-wide accumulation: pure VALU adds of static 128-lane slices; keeps
        # the XLU cross-lane reduce off the per-tile critical path.
        acc = l_scr[...]
        for j in range(block_k // _LANES):
            acc = acc + ev[:, j * _LANES:(j + 1) * _LANES]
        l_scr[...] = acc

    row0 = i * block_m
    col0 = k * block_k
    touches_diag = jnp.logical_and(row0 < col0 + block_k, col0 < row0 + block_m)
    touches_pad = col0 + block_k > n_real
    needs_mask = jnp.logical_or(touches_diag, touches_pad)

    # Only tiles intersecting the diagonal or the padded columns pay for the mask.
    @pl.when(needs_mask)
    def _masked():
        rows = row0 + lax.broadcasted_iota(jnp.int32, (block_m, block_k), 0)
        cols = col0 + lax.broadcasted_iota(jnp.int32, (block_m, block_k), 1)
        invalid = jnp.logical_or(rows == cols, cols >= n_real)
        _accumulate(jnp.where(invalid, 0.0, e))

    @pl.when(jnp.logical_not(needs_mask))
    def _unmasked():
        _accumulate(e)

    @pl.when(k == nk - 1)
    def _finalize():
        lse_ref[...] = shift + jnp.log(
            jnp.sum(l_scr[...], axis=-1, keepdims=True))


def nt_xent_loss(z_i, z_j, temperature=0.5, *, block_m=None, block_k=None,
                 matmul_dtype=jnp.bfloat16):
    """NT-Xent (SimCLR) loss; z_i, z_j: (B, D). Returns scalar float32.

    For very small temperatures (<~0.1) pass matmul_dtype=jnp.float32 if tighter
    agreement with an f32 reference is required (bf16 sim error scales ~2^-8/T).
    """
    z_i = jnp.asarray(z_i, jnp.float32)
    z_j = jnp.asarray(z_j, jnp.float32)
    B, D = z_i.shape
    N = 2 * B
    inv_temp = 1.0 / float(temperature)

    # Normalize once (one mem-bound O(N*D) pass) and fold sqrt(1/T) into the
    # features so the in-kernel dot product is already cos/T.
    # TODO(synk): PyTorch CosineSimilarity clamps ||x||*||y|| at eps=1e-8 jointly
    # (not each norm separately); differs only for near-zero feature vectors.
    z = jnp.concatenate([z_i, z_j], axis=0)
    norm = jnp.sqrt(jnp.sum(z * z, axis=-1, keepdims=True))
    zn = z / jnp.maximum(norm, 1e-8)
    zn_scaled = zn * jnp.float32(math.sqrt(inv_temp))

    # Sum of positive logits: sum_r sim[r, (r+B)%N] == (2/T) * sum(zn_i . zn_j),
    # computed once in f32 (no (N,N) masks, no per-row extraction).
    pos_sum = (2.0 * inv_temp) * jnp.sum(zn[:B] * zn[B:])

    # Tile sizes.  Column blocks are large (amortize the ~0.35us per-grid-step
    # overhead and per-tile bookkeeping); row blocks are half the column block so
    # they divide the padded N exactly and the "parallel" row axis always has
    # >=2 blocks (keeps both v7x TensorCores busy).  Actual VMEM use is a few
    # MiB -- far below every generation's capacity -- so no v5e-specific shrink.
    n128 = _round_up(N, _LANES)
    if block_k is None:
        block_k = min(1024, n128)
    if block_m is None:
        block_m = min(512, max(16, block_k // 2))
    assert block_m % 16 == 0 and block_k % _LANES == 0, (block_m, block_k)

    n_pad = _round_up(N, math.lcm(block_m, block_k))
    d_pad = _round_up(D, _LANES)                     # lane-dense feature dim
    zn_mm = jnp.pad(zn_scaled, ((0, n_pad - N), (0, d_pad - D))).astype(matmul_dtype)

    grid = (n_pad // block_m, n_pad // block_k)
    itemsize = jnp.dtype(matmul_dtype).itemsize
    vmem_bytes = (2 * block_m * d_pad * itemsize     # row tile (double-buffered)
                  + 2 * block_k * d_pad * itemsize   # col tile (double-buffered)
                  + block_m * block_k * 4            # compiler's dot-result temp
                  + block_m * _LANES * 4             # lane-wide exp-sum accumulator
                  + 2 * block_m * 4)                 # lse output
    vmem_limit = int(min(64 * 1024 * 1024, max(2 * vmem_bytes, 16 * 1024 * 1024)))

    # Fixed shift replaces the online max: cos <= 1 => sim <= 1.02/T (margin for
    # bf16 error).  When even the unshifted sum cannot overflow f32 (typical
    # temperatures), drop the per-element subtraction entirely.
    raw_peak = 1.02 * inv_temp + math.log(max(n_pad, 2))
    shift = 0.0 if raw_peak < 80.0 else 1.02 * inv_temp

    kernel = functools.partial(
        _nt_xent_lse_kernel, n_real=N, shift=shift,
        block_m=block_m, block_k=block_k)

    lse = pl.pallas_call(
        kernel,
        out_shape=jax.ShapeDtypeStruct((n_pad, 1), jnp.float32),
        grid_spec=pltpu.PrefetchScalarGridSpec(
            num_scalar_prefetch=0,
            grid=grid,
            in_specs=[
                pl.BlockSpec((block_m, d_pad), lambda i, k: (i, 0)),  # row tile (resident over k)
                pl.BlockSpec((block_k, d_pad), lambda i, k: (k, 0)),  # col tile
            ],
            out_specs=pl.BlockSpec((block_m, 1), lambda i, k: (i, 0)),
            scratch_shapes=[
                pltpu.VMEM((block_m, _LANES), jnp.float32),  # lane-wide exp-sum acc
            ],
        ),
        compiler_params=pltpu.CompilerParams(
            dimension_semantics=("parallel", "arbitrary"),
            vmem_limit_bytes=vmem_limit,
        ),
    )(zn_mm, zn_mm)

    loss = (jnp.sum(lse[:N, 0]) - pos_sum) / N
    return loss


def _nt_xent_ref(z_i, z_j, temperature=0.5):
    """Pure-JAX f32 reference mirroring the PyTorch module exactly."""
    z = jnp.concatenate([z_i, z_j], axis=0).astype(jnp.float32)
    N = z.shape[0]
    B = N // 2
    norm = jnp.maximum(jnp.linalg.norm(z, axis=-1, keepdims=True), 1e-8)
    zn = z / norm
    sim = (zn @ zn.T) / temperature
    sim_valid = jnp.where(jnp.eye(N, dtype=bool), -jnp.inf, sim)
    pos = sim[jnp.arange(N), (jnp.arange(N) + B) % N]
    lse = jax.scipy.special.logsumexp(sim_valid, axis=-1)
    return jnp.sum(lse - pos) / N


if __name__ == "__main__":
    batch_size = 4
    hidden = 32
    temperature = 0.5

    key = jax.random.PRNGKey(0)
    k1, k2 = jax.random.split(key)
    z_i = jax.random.normal(k1, (batch_size, hidden), dtype=jnp.float32)
    z_j = jax.random.normal(k2, (batch_size, hidden), dtype=jnp.float32)

    loss = nt_xent_loss(z_i, z_j, temperature)
    loss = jax.block_until_ready(loss)

    ref = _nt_xent_ref(z_i, z_j, temperature)
    # bf16 MXU inputs (f32 accumulation) -> relaxed tolerance vs the f32 reference.
    assert jnp.allclose(loss, ref, rtol=2e-2, atol=2e-2), (loss, ref)

    print("KERNEL_OK")
</pallas_src>

<mosaic_0001>
module attributes {stable_mosaic.version = 11 : i64} {
  func.func @_nt_xent_lse_kernel(%arg0: i32, %arg1: i32, %arg2: memref<64x128xbf16, #tpu.memory_space<vmem>>, %arg3: memref<128x128xbf16, #tpu.memory_space<vmem>>, %arg4: memref<64x1xf32, #tpu.memory_space<vmem>>, %arg5: memref<64x128xf32, #tpu.memory_space<vmem>>) attributes {dimension_semantics = [#tpu.dimension_semantics<parallel>, #tpu.dimension_semantics<arbitrary>], iteration_bounds = array<i64: 2, 1>, scalar_prefetch = 0 : i64, scratch_operands = 1 : i64, tpu.core_type = #tpu.core_type<tc>, window_params = [{transform_indices = @transform_0, window_bounds = array<i64: 64, 128>}, {transform_indices = @transform_1, window_bounds = array<i64: 128, 128>}, {transform_indices = @transform_2, window_bounds = array<i64: 64, 1>}]} {
    %c0_i32 = arith.constant 0 : i32
    %0 = arith.cmpi eq, %arg1, %c0_i32 : i32
    %1 = arith.extui %0 : i1 to i32
    %c0_i32_0 = arith.constant 0 : i32
    %2 = arith.cmpi ne, %1, %c0_i32_0 : i32
    scf.if %2 {
      %cst_11 = arith.constant 0.000000e+00 : f32
      %25 = vector.broadcast %cst_11 : f32 to vector<64x128xf32>
      %c0_12 = arith.constant 0 : index
      %c0_13 = arith.constant 0 : index
      %26 = vector.load %arg5[%c0_12, %c0_13] : memref<64x128xf32, #tpu.memory_space<vmem>>, vector<64x128xf32>
      tpu.vector_store %arg5[%c0_12, %c0_13], %25 {strides = array<i32>} : memref<64x128xf32, #tpu.memory_space<vmem>>, vector<64x128xf32>,
    } else {
    }
    %c0 = arith.constant 0 : index
    %c0_1 = arith.constant 0 : index
    %3 = vector.load %arg2[%c0, %c0_1] : memref<64x128xbf16, #tpu.memory_space<vmem>>, vector<64x128xbf16>
    %c0_2 = arith.constant 0 : index
    %c0_3 = arith.constant 0 : index
    %4 = vector.load %arg3[%c0_2, %c0_3] : memref<128x128xbf16, #tpu.memory_space<vmem>>, vector<128x128xbf16>
    %cst = arith.constant dense<0.000000e+00> : vector<64x128xf32>
    %5 = tpu.matmul %3, %4, %cst {dimension_numbers = #tpu.dot_dimension_numbers<[1], [1], [0], [0], [0, 0, 1, 0], [], []>} : vector<64x128xbf16>, vector<128x128xbf16>, vector<64x128xf32> -> vector<64x128xf32>
    %6 = math.exp %5 : vector<64x128xf32>
    %c64_i32 = arith.constant 64 : i32
    %7 = arith.muli %arg0, %c64_i32 : i32
    %c128_i32 = arith.constant 128 : i32
    %8 = arith.muli %arg1, %c128_i32 : i32
    %c128_i32_4 = arith.constant 128 : i32
    %9 = arith.addi %8, %c128_i32_4 : i32
    %10 = arith.cmpi slt, %7, %9 : i32
    %c64_i32_5 = arith.constant 64 : i32
    %11 = arith.addi %7, %c64_i32_5 : i32
    %12 = arith.cmpi slt, %8, %11 : i32
    %13 = arith.andi %10, %12 : i1
    %c128_i32_6 = arith.constant 128 : i32
    %14 = arith.addi %8, %c128_i32_6 : i32
    %c8_i32 = arith.constant 8 : i32
    %15 = arith.cmpi sgt, %14, %c8_i32 : i32
    %16 = arith.ori %13, %15 : i1
    %17 = arith.extui %16 : i1 to i32
    %c0_i32_7 = arith.constant 0 : i32
    %18 = arith.cmpi ne, %17, %c0_i32_7 : i32
    scf.if %18 {
      %25 = tpu.iota {dimensions = array<i32: 0>} : vector<64x128xi32>
      %26 = vector.broadcast %7 : i32 to vector<64x128xi32>
      %27 = arith.addi %26, %25 : vector<64x128xi32>
      %28 = tpu.iota {dimensions = array<i32: 1>} : vector<64x128xi32>
      %29 = vector.broadcast %8 : i32 to vector<64x128xi32>
      %30 = arith.addi %29, %28 : vector<64x128xi32>
      %31 = arith.cmpi eq, %27, %30 : vector<64x128xi32>
      %c8_i32_11 = arith.constant 8 : i32
      %32 = vector.broadcast %c8_i32_11 : i32 to vector<64x128xi32>
      %33 = arith.cmpi sge, %30, %32 : vector<64x128xi32>
      %34 = arith.ori %31, %33 : vector<64x128xi1>
      %cst_12 = arith.constant 0.000000e+00 : f32
      %35 = vector.broadcast %cst_12 : f32 to vector<64x128xf32>
      %36 = arith.select %34, %35, %6 : vector<64x128xi1>, vector<64x128xf32>
      %c0_13 = arith.constant 0 : index
      %c0_14 = arith.constant 0 : index
      %37 = vector.load %arg5[%c0_13, %c0_14] : memref<64x128xf32, #tpu.memory_space<vmem>>, vector<64x128xf32>
      %38 = arith.addf %37, %36 : vector<64x128xf32>
      %c0_15 = arith.constant 0 : index
      %c0_16 = arith.constant 0 : index
      %39 = vector.load %arg5[%c0_15, %c0_16] : memref<64x128xf32, #tpu.memory_space<vmem>>, vector<64x128xf32>
      tpu.vector_store %arg5[%c0_15, %c0_16], %38 {strides = array<i32>} : memref<64x128xf32, #tpu.memory_space<vmem>>, vector<64x128xf32>,
    } else {
    }
    %true = arith.constant true
    %19 = arith.xori %16, %true : i1
    %20 = arith.extui %19 : i1 to i32
    %c0_i32_8 = arith.constant 0 : i32
    %21 = arith.cmpi ne, %20, %c0_i32_8 : i32
    scf.if %21 {
      %c0_11 = arith.constant 0 : index
      %c0_12 = arith.constant 0 : index
      %25 = vector.load %arg5[%c0_11, %c0_12] : memref<64x128xf32, #tpu.memory_space<vmem>>, vector<64x128xf32>
      %26 = arith.addf %25, %6 : vector<64x128xf32>
      %c0_13 = arith.constant 0 : index
      %c0_14 = arith.constant 0 : index
      %27 = vector.load %arg5[%c0_13, %c0_14] : memref<64x128xf32, #tpu.memory_space<vmem>>, vector<64x128xf32>
      tpu.vector_store %arg5[%c0_13, %c0_14], %26 {strides = array<i32>} : memref<64x128xf32, #tpu.memory_space<vmem>>, vector<64x128xf32>,
    } else {
    }
    %c0_i32_9 = arith.constant 0 : i32
    %22 = arith.cmpi eq, %arg1, %c0_i32_9 : i32
    %23 = arith.extui %22 : i1 to i32
    %c0_i32_10 = arith.constant 0 : i32
    %24 = arith.cmpi ne, %23, %c0_i32_10 : i32
    scf.if %24 {
      %c0_11 = arith.constant 0 : index
      %c0_12 = arith.constant 0 : index
      %25 = vector.load %arg5[%c0_11, %c0_12] : memref<64x128xf32, #tpu.memory_space<vmem>>, vector<64x128xf32>
      %cst_13 = arith.constant dense<0.000000e+00> : vector<64xf32>
      %26 = vector.multi_reduction <add>, %25, %cst_13 [1] : vector<64x128xf32> to vector<64xf32>
      %27 = vector.shape_cast %26 : vector<64xf32> to vector<64x1xf32>
      %28 = math.log %27 : vector<64x1xf32>
      %cst_14 = arith.constant 0.000000e+00 : f32
      %29 = vector.broadcast %cst_14 : f32 to vector<64x1xf32>
      %30 = arith.addf %29, %28 : vector<64x1xf32>
      %c0_15 = arith.constant 0 : index
      %c0_16 = arith.constant 0 : index
      %31 = vector.load %arg4[%c0_15, %c0_16] : memref<64x1xf32, #tpu.memory_space<vmem>>, vector<64x1xf32>
      tpu.vector_store %arg4[%c0_15, %c0_16], %30 {strides = array<i32>} : memref<64x1xf32, #tpu.memory_space<vmem>>, vector<64x1xf32>,
    } else {
    }
    return
  }
  func.func @transform_0(%arg0: i32, %arg1: i32) -> (i32, i32) {
    %c0_i32 = arith.constant 0 : i32
    %c0_i32_0 = arith.constant 0 : i32
    return %arg0, %c0_i32 : i32, i32
  }
  func.func @transform_1(%arg0: i32, %arg1: i32) -> (i32, i32) {
    %c0_i32 = arith.constant 0 : i32
    %c0_i32_0 = arith.constant 0 : i32
    return %arg1, %c0_i32 : i32, i32
  }
  func.func @transform_2(%arg0: i32, %arg1: i32) -> (i32, i32) {
    %c0_i32 = arith.constant 0 : i32
    %c0_i32_0 = arith.constant 0 : i32
    return %arg0, %c0_i32 : i32, i32
  }
}

</mosaic_0001>

<bundles_post_ra>
// kernel: tpu_custom_call.1
= control target key start
LH: loop header
LB: loop body
LE: loop exit
PB: predicated region body
PF: predicated region fallthrough
CT: control target
= control target key end

     0   :  { %7 = vsyncpa [#allocation4], 0  ;;  %s1170_s0 = inlined_call_operand.hbm [shape: bf16[128,128], index: 0, kind: input, shape index: {}]   ;;  %s1171_s1 = inlined_call_operand.hbm [shape: bf16[128,128], index: 1, kind: input, shape index: {}]   ;;  %s1172_s2 = inlined_call_operand.vmem [shape: f32[128,1], index: 2, kind: output, shape index: {}]  }
   0x1   :  { %9 = vsyncpa [#allocation4 + $0x1], 0 }
   0x2   :  { %10 = vsyncpa [#allocation6], 0  ;;  %s978_s9 = smov 0   ;;  %s980_s10 = smov 0  }
   0x3   :  { %s982_s11 = smov 0   ;;  %s984_s12 = smov 0  }
   0x4   :  { %s986_s13 = smov 0   ;;  %s988_s14 = smov 0  }
   0x5 LB: > { %s651_s15 = sadd.s32 4294967295, %s957_s14   ;;  %p48_p0 = scmp.ne.s32.totalorder %s941_s10, %s937_s9  ;;  %s957_s14 = sphi %s988_s14, %s16_s14   ;;  %s953_s13 = sphi %s986_s13, %s1191_s13   ;;  %s949_s12 = sphi %s984_s12, %s1190_s12   ;;  %s945_s11 = sphi %s982_s11, %s1189_s11   ;;  %s941_s10 = sphi %s980_s10, %s1188_s10   ;;  %s937_s9 = sphi %s978_s9, %s1187_s9  }
   0x6   : > { %p1008_p1 = scmp.eq.s32.totalorder %s651_s15, 0  ;;  %p653_p2 = scmp.ge.s32.totalorder %s957_s14, 1 }
   0x7   : > { %p111_p3 = scmp.lt.s32.totalorder %s957_s14, 3  ;;  %s959_s19 = smov [#allocation5]  }
   0x8   : > { %s1177_s16 = scalar_select %p1008_p1, 1, 0 }
   0x9   : > { %p1016_p4 = por %p1008_p1, %p48_p0  ;;  %p1020_p5 = pnand %p653_p2, %p111_p3 }
   0xa   : > { %s126_s20 = sshll.u32 %s959_s19, 4  ;;  %s28_s22 = sadd.s32 1, %s953_s13  ;;  %s127_s20 = int_to_ptr.vmem [resolvable:$true] %s126_s20 }
   0xb   : > { %s1178_s17 = scalar_select %p1016_p4, 1, 0 }
   0xc   : > { %s1179_s18 = scalar_select %p1020_p5, 1, 0 }
   0xd   : > { %p739_p6 = pneg %p1020_p5  ;;  %s845_s25 = scalar_lea.hbm %s1171_s1, 1024 }
   0xe   : > { %p846_p8 = scmp.ne.s32.totalorder %s1171_s1, %s845_s25  ;;  %p852_p12 = scmp.lt.u32.totalorder %s845_s25, %s1171_s1 }
   0xf   : > { %p1028_p7 = pnand %p739_p6, %p1008_p1 }
  0x11   : > { %p847_p9 = pneg %p1028_p7 }
  0x13   : > { %p848_p10 = pnand %p847_p9, %p846_p8 }
  0x15   : > { %p849_p11 = pneg %p848_p10 }
  0x17   : > { %p854_p13 = pnand %p852_p12, %p849_p11 }
  0x19   : > { %857 = shalt.err (!%p854_p13)
}
  0x1a   : > { %s858_s30 = scalar_lea.vmem %s127_s20, 1024  ;;  %p866_p6 = scmp.lt.s32.totalorder %s127_s20, %s127_s20 }
  0x1b   : > { %p859_p0 = scmp.ne.s32.totalorder %s127_s20, %s858_s30  ;;  %p867_p1 = scmp.lt.s32.totalorder %s858_s30, %s858_s30 }
  0x1d   : > { %p861_p2 = pnand %p859_p0, %p847_p9  ;;  %p868_p4 = por %p867_p1, %p866_p6 }
  0x1f   : > { %p862_p3 = pneg %p861_p2 }
  0x21   : > { %p869_p5 = pnand %p868_p4, %p862_p3 }
  0x23   : > { %872 = shalt.err (!%p869_p5)
}
  0x24   : > { %s960_s3 = smov 64   ;;  %s961_s4 = smov 4  }
  0x25   : > { %742 = dma.hbm_to_vmem [thread:$0]  (!%p1028_p7), %s1171_s1, 1024, %s127_s20, [#allocation6], %s960_s3, %s960_s3, %s961_s4  }
  0x26   : > { %p30_p1 = scmp.ge.s32.totalorder %s28_s22, 2  ;;  %s35_s7 = sadd.s32 1, %s945_s11 }
  0x27   : > { %p42_p4 = scmp.ne.s32.totalorder %s945_s11, %s941_s10  ;;  %p43_p5 = scmp.eq.s32.totalorder %s957_s14, 0 }
  0x28   : > { %s1193_s22 = smov (%p30_p1, %s28_s22), 0  ;;  %p748_p9 = scmp.lt.s32.totalorder %s957_s14, 2 }
  0x29   : > { %p44_p8 = por %p43_p5, %p42_p4  ;;  %s32_s8 = ssub.s32 %s953_s13, %s1193_s22 }
  0x2a   : > { %s140_s9 = sand.u32 1, %s945_s11   ;;  %p33_p10 = scmp.eq.s32.totalorder %s32_s8, 0 }
  0x2b   : > { %s656_s15 = sshll.u32 %s140_s9, 5  ;;  %s680_s19 = sshll.u32 %s953_s13, 9 }
  0x2c   : > { %s1064_s21 = scalar_select %p33_p10, %s945_s11, %s35_s7  }
  0x2d   : > { %s1069_s20 = scalar_lea.hbm %s1170_s0, %s680_s19  ;;  %s144_s25 = scalar_lea.vmem [#allocation3], %s656_s15 }
  0x2e   : > { %s151_s26 = sshll.u32 %s144_s25, 4  ;;  %p1071_p7 = pnand %p748_p9, %p44_p8  ;;  %s1075_s26 = int_to_ptr.vmem [resolvable:$true] %s151_s26 }
  0x2f   : > { %s1077_s28 = scalar_lea.sflag [#allocation4], %s140_s9  ;;  %s873_s29 = scalar_lea.hbm %s1069_s20, 512 }
  0x30   : > { %p874_p11 = scmp.ne.s32.totalorder %s1069_s20, %s873_s29  ;;  %p875_p12 = pneg %p1071_p7 }
  0x31   : > { %s878_s6 = scalar_lea.hbm %s1170_s0, 1024  ;;  %p879_p2 = scmp.lt.u32.totalorder %s1069_s20, %s1170_s0 }
  0x32   : > { %p876_p13 = pnand %p875_p12, %p874_p11  ;;  %p880_p3 = scmp.lt.u32.totalorder %s878_s6, %s873_s29 }
  0x33   : > { %p882_p1 = scmp.lt.u32.totalorder %s873_s29, %s1069_s20 }
  0x34   : > { %p877_p0 = pneg %p876_p13  ;;  %p881_p6 = por %p880_p3, %p879_p2 }
  0x36   : > { %p883_p4 = por %p882_p1, %p881_p6 }
  0x38   : > { %p884_p5 = pnand %p883_p4, %p877_p0 }
  0x3a   : > { %887 = shalt.err (!%p884_p5)
}
  0x3b   : > { %s888_s9 = scalar_lea.vmem %s1075_s26, 512  ;;  %s962_s15 = smov [#allocation3]  }
  0x3c   : > { %p889_p8 = scmp.ne.s32.totalorder %s1075_s26, %s888_s9  ;;  %s893_s19 = sshll.u32 %s962_s15, 4  ;;  %s894_s19 = int_to_ptr.vmem [resolvable:$false] %s893_s19 }
  0x3d   : > { %s895_s23 = scalar_lea.vmem %s894_s19, 1024  ;;  %p896_p11 = scmp.lt.s32.totalorder %s1075_s26, %s894_s19 }
  0x3e   : > { %p891_p9 = pnand %p889_p8, %p875_p12  ;;  %p897_p13 = scmp.lt.s32.totalorder %s895_s23, %s888_s9 }
  0x40   : > { %p892_p10 = pneg %p891_p9  ;;  %p898_p2 = por %p897_p13, %p896_p11 }
  0x42   : > { %p899_p3 = pnand %p898_p2, %p892_p10 }
  0x44   : > { %902 = shalt.err (!%p899_p3)
}
  0x45   : > { %746 = dma.hbm_to_vmem [thread:$0]  (!%p1071_p7), %s1069_s20, 512, %s1075_s26, %s1077_s28, %s960_s3, %s960_s3, %s961_s4  }
  0x46   : > { %p1182_p12 = scmp.ne.s32.totalorder %s1179_s18, 0 }
  0x47   : > { %s165_s24 = sand.u32 (!%p1182_p12), 1, %s941_s10   ;;  %p1183_p0 = scmp.ne.s32.totalorder (!%p1182_p12), %s1178_s17, 0 }
  0x48   : > { %163 = sbr.rel (%p1182_p12) target bundleno = 543 (0x21f), region = 28  ;;  %s660_s25 = sshll.u32 (!%p1182_p12), %s165_s24, 5 }
  0x49   : > { %s166_s29 = scalar_lea.sflag (!%p1182_p12), [#allocation4], %s165_s24  ;;  %s1111_s30 = scalar_lea.vmem (!%p1182_p12), [#allocation3], %s660_s25 }
  0x4f   : > { %928 = dma.done.wait (%p1183_p0), %s166_s29, 512  }
  0x50   : > { %930 = vsyncadd (%p1183_p0), %s166_s29, 4294966784  ;;  %p1184_p6 = scmp.ne.s32.totalorder %s1177_s16, 0 }
  0x52   : > { %932 = dma.done.wait (%p1184_p6), [#allocation6], 1024  }
  0x53   : > { %934 = vsyncadd (%p1184_p6), [#allocation6], 4294966272  ;;  %v801_v0 = vld [vmem:[#allocation5] sm:$0xff]   ;;  %v802_v1 = vld [vmem:[#allocation5 + $0x8] sm:$0xff]   ;;  %v405_v12 = vlaneseq  ;;  %s676_s16 = sshll.u32 %s949_s12, 6  ;;  %s662_s17 = sshll.u32 %s949_s12, 3 }
  0x54   : > { %693 = vmatprep.subr.bf16.mxu0 %v801_v0  ;;  %717 = vmatprep.subr.bf16.mxu1 %v801_v0  ;;  %v803_v2 = vld [vmem:[#allocation5 + $0x10] sm:$0xff]   ;;  %v809_v3 = vld [vmem:[%s1111_s30] sm:$0xff]   ;;  %v804_v5 = vld [vmem:[#allocation5 + $0x18] sm:$0xff]   ;;  %v414_v20 = vstv %s676_s16  ;;  %p197_p7 = scmp.lt.s32.totalorder %s662_s17, 15 }
  0x55   : > { %694 = vmatpush3.bf16.xpose.msra.mxu0 %v801_v0  ;;  %725 = vmatpush3.bf16.xpose.msra.mxu1 %v801_v0  ;;  %v811_v4 = vld [vmem:[%s1111_s30 + $0x10] sm:$0xff]   ;;  %v805_v6 = vld [vmem:[#allocation5 + $0x20] sm:$0xff]   ;;  %v806_v7 = vld [vmem:[#allocation5 + $0x28] sm:$0xff]   ;;  %v406_v13 = vshrl.u32 %v405_v12, 7  ;;  %v424_v30 = vand.u32 127, %v405_v12 }
  0x56   : > { %695 = vmatprep.subr.bf16.mxu0 %v802_v1  ;;  %718 = vmatprep.subr.bf16.mxu1 %v802_v1  ;;  %v807_v8 = vld [vmem:[#allocation5 + $0x30] sm:$0xff]   ;;  %v808_v9 = vld [vmem:[#allocation5 + $0x38] sm:$0xff]   ;;  %v810_v10 = vld [vmem:[%s1111_s30 + $0x8] sm:$0xff]   ;;  %s1195_s17 = smov (!%p197_p7, %s662_s17), 15 }
  0x57   : > { %709 = vmatprep.mubr.bf16.mxu0 %v809_v3  ;;  %713 = vmatprep.mubr.bf16.mxu1 %v811_v4  ;;  %v812_v11 = vld [vmem:[%s1111_s30 + $0x18] sm:$0xff]   ;;  %v408_v16 = vadd.s32 16, %v406_v13  ;;  %v409_v24 = vadd.s32 24, %v406_v13  ;;  %v410_v31 = vadd.s32 32, %v406_v13  ;;  %v415_v33 = vadd.s32 %v414_v20, %v406_v13  ;;  %s663_s18 = sshll.u32 %s1195_s17, 3 }
  0x58   : > { %vm435_vm1 = vcmp.ge.s32.totalorder %v424_v30, 8  ;;  %v411_v37 = vadd.s32 40, %v406_v13  ;;  %v407_v39 = vadd.s32 8, %v406_v13  ;;  %v413_v43 = vadd.s32 56, %v406_v13  ;;  %s200_s12 = scalar_lea.vmem %s1172_s2, %s663_s18 }
  0x59   : > { %v417_v29 = vadd.s32 %v414_v20, %v408_v16  ;;  %v418_v35 = vadd.s32 %v414_v20, %v409_v24  ;;  %v419_v36 = vadd.s32 %v414_v20, %v410_v31  ;;  %vm427_vm2 = vcmp.eq.s32.totalorder %v415_v33, %v424_v30 }
  0x5a   : > { %vm1128_vm5 = vmor %vm427_vm2, %vm435_vm1  ;;  %v420_v42 = vadd.s32 %v414_v20, %v411_v37  ;;  %v416_v45 = vadd.s32 %v414_v20, %v407_v39  ;;  %v412_v46 = vadd.s32 48, %v406_v13  ;;  %v422_v51 = vadd.s32 %v414_v20, %v413_v43 }
  0x5b   : > { %vm429_vm0 = vcmp.eq.s32.totalorder %v417_v29, %v424_v30  ;;  %vm430_vm4 = vcmp.eq.s32.totalorder %v418_v35, %v424_v30  ;;  %vm431_vm6 = vcmp.eq.s32.totalorder %v419_v36, %v424_v30 }
  0x5c   : > { %vm438_vm3 = vmor %vm429_vm0, %vm435_vm1  ;;  %vm432_vm9 = vcmp.eq.s32.totalorder %v420_v42, %v424_v30  ;;  %vm428_vm10 = vcmp.eq.s32.totalorder %v416_v45, %v424_v30  ;;  %v421_v53 = vadd.s32 %v414_v20, %v412_v46  ;;  %vm434_vm13 = vcmp.eq.s32.totalorder %v422_v51, %v424_v30 }
  0x5d   : > { %696 = vmatpush3.bf16.xpose.msra.mxu0 %v802_v1  ;;  %726 = vmatpush3.bf16.xpose.msra.mxu1 %v802_v1  ;;  %vm439_vm7 = vmor %vm430_vm4, %vm435_vm1 }
  0x5e   : > { %697 = vmatprep.subr.bf16.mxu0 %v803_v2  ;;  %719 = vmatprep.subr.bf16.mxu1 %v803_v2  ;;  %vm440_vm8 = vmor %vm431_vm6, %vm435_vm1  ;;  %vm433_vm14 = vcmp.eq.s32.totalorder %v421_v53, %v424_v30 }
  0x5f   : > { %vm441_vm11 = vmor %vm432_vm9, %vm435_vm1 }
  0x60   : > { %vm437_vm12 = vmor %vm428_vm10, %vm435_vm1 }
  0x61   : > { %vm443_vm15 = vmor %vm434_vm13, %vm435_vm1 }
  0x62   : > { %vm442_vm0 = vmor %vm433_vm14, %vm435_vm1  ;;  %vm554_vm1 = vcmask 7168  }
  0x65   : > { %698 = vmatpush3.bf16.xpose.msra.mxu0 %v803_v2  ;;  %727 = vmatpush3.bf16.xpose.msra.mxu1 %v803_v2 }
  0x66   : > { %699 = vmatprep.subr.bf16.mxu0 %v804_v5  ;;  %720 = vmatprep.subr.bf16.mxu1 %v804_v5 }
  0x6d   : > { %700 = vmatpush3.bf16.xpose.msra.mxu0 %v804_v5  ;;  %728 = vmatpush3.bf16.xpose.msra.mxu1 %v804_v5 }
  0x6e   : > { %701 = vmatprep.subr.bf16.mxu0 %v805_v6  ;;  %721 = vmatprep.subr.bf16.mxu1 %v805_v6 }
  0x75   : > { %702 = vmatpush3.bf16.xpose.msra.mxu0 %v805_v6  ;;  %729 = vmatpush3.bf16.xpose.msra.mxu1 %v805_v6 }
  0x76   : > { %703 = vmatprep.subr.bf16.mxu0 %v806_v7  ;;  %722 = vmatprep.subr.bf16.mxu1 %v806_v7 }
  0x7d   : > { %704 = vmatpush3.bf16.xpose.msra.mxu0 %v806_v7  ;;  %730 = vmatpush3.bf16.xpose.msra.mxu1 %v806_v7 }
  0x7e   : > { %705 = vmatprep.subr.bf16.mxu0 %v807_v8  ;;  %723 = vmatprep.subr.bf16.mxu1 %v807_v8 }
  0x85   : > { %706 = vmatpush3.bf16.xpose.msra.mxu0 %v807_v8  ;;  %731 = vmatpush3.bf16.xpose.msra.mxu1 %v807_v8 }
  0x86   : > { %707 = vmatprep.subr.bf16.mxu0 %v808_v9  ;;  %724 = vmatprep.subr.bf16.mxu1 %v808_v9 }
  0x8d   : > { %708 = vmatpush3.bf16.xpose.msra.mxu0 %v808_v9  ;;  %732 = vmatpush3.bf16.xpose.msra.mxu1 %v808_v9 }
  0x94   : > { %710 = vmatmul.mubr.bf16.vlgmr.msra.gmra.mrb[0].mxu0 %v810_v10  ;;  %714 = vmatmul.mubr.bf16.vlgmr.msra.gmra.mrb[0].mxu1 %v812_v11 }
 0x167   : > { %v711_v14 = vpop.f32.mrb[0].mxu0  ;;  %v715_v15 = vpop.f32.mrb[0].mxu1 }
 0x168   : > { %v380_v17 = vmul.f32 1.442695, %v711_v14  ;;  %v345_v18 = vpop.f32.mrb[1].mxu0  ;;  %v361_v19 = vpop.f32.mrb[1].mxu1  ;;  %v388_v40 = vmul.f32 1.442695, %v715_v15 }
 0x169   : > { %v376_v21 = vmul.f32 1.442695, %v345_v18  ;;  %v712_v22 = vpop.f32.mrb[2].mxu0  ;;  %v716_v23 = vpop.f32.mrb[2].mxu1  ;;  %v384_v26 = vmul.f32 1.442695, %v361_v19 }
 0x16a   : > { %813 = vpow2.f32 %v380_v17  ;;  %v382_v25 = vmul.f32 1.442695, %v712_v22  ;;  %v348_v27 = vpop.f32.mrb[3].mxu0  ;;  %v364_v28 = vpop.f32.mrb[3].mxu1  ;;  %v390_v38 = vmul.f32 1.442695, %v716_v23 }
 0x16b   : > { %815 = vpow2.f32 %v376_v21  ;;  %v378_v32 = vmul.f32 1.442695, %v348_v27  ;;  %v386_v34 = vmul.f32 1.442695, %v364_v28 }
 0x16c   : > { %817 = vpow2.f32 %v382_v25 }
 0x16d   : > { %819 = vpow2.f32 %v384_v26 }
 0x16e   : > { %821 = vpow2.f32 %v378_v32 }
 0x16f   : > { %823 = vpow2.f32 %v386_v34 }
 0x170   : > { %825 = vpow2.f32 %v390_v38 }
 0x171   : > { %827 = vpow2.f32 %v388_v40 }
 0x174   : > { %v814_v44 = vpop.eup %813 }
 0x175   : > { %v816_v47 = vpop.eup %815  ;;  %v446_v48 = vsel %vm438_vm3, 0.0, %v814_v44 }
 0x176   : > { %518 = vadd.xlane.f32.xlu1 %v446_v48  ;;  %v444_v49 = vsel %vm1128_vm5, 0.0, %v816_v47  ;;  %v818_v50 = vpop.eup %817 }
 0x177   : > { %514 = vadd.xlane.f32.xlu0 %v444_v49  ;;  %v820_v52 = vpop.eup %819  ;;  %v447_v54 = vsel %vm439_vm7, 0.0, %v818_v50 }
 0x178   : > { %v448_v55 = vsel %vm440_vm8, 0.0, %v820_v52  ;;  %v822_v56 = vpop.eup %821 }
 0x179   : > { %v824_v57 = vpop.eup %823  ;;  %v445_v60 = vsel %vm437_vm12, 0.0, %v822_v56 }
 0x17a   : > { %520 = vadd.xlane.f32.xlu1 %v447_v54  ;;  %v449_v58 = vsel %vm441_vm11, 0.0, %v824_v57  ;;  %v826_v59 = vpop.eup %825 }
 0x17b   : > { %522 = vadd.xlane.f32.xlu0 %v448_v55  ;;  %v828_v61 = vpop.eup %827  ;;  %v451_v62 = vsel %vm443_vm15, 0.0, %v826_v59 }
 0x17c   : > { %v450_v63 = vsel %vm442_vm0, 0.0, %v828_v61 }
 0x17e   : > { %524 = vadd.xlane.f32.xlu1 %v449_v58 }
 0x17f   : > { %516 = vadd.xlane.f32.xlu0 %v445_v60 }
 0x182   : > { %528 = vadd.xlane.f32.xlu1 %v451_v62 }
 0x183   : > { %526 = vadd.xlane.f32.xlu0 %v450_v63 }
 0x203   : > { %v519_v0 = vpop.xlane.xlu1 %518 }
 0x204   : > { %829 = vlog2.f32 %v519_v0  ;;  %v515_v1 = vpop.xlane.xlu0 %514 }
 0x205   : > { %831 = vlog2.f32 %v515_v1 }
 0x207   : > { %v521_v2 = vpop.xlane.xlu1 %520 }
 0x208   : > { %833 = vlog2.f32 %v521_v2  ;;  %v523_v3 = vpop.xlane.xlu0 %522 }
 0x209   : > { %835 = vlog2.f32 %v523_v3 }
 0x20b   : > { %v525_v4 = vpop.xlane.xlu1 %524 }
 0x20c   : > { %837 = vlog2.f32 %v525_v4  ;;  %v517_v5 = vpop.xlane.xlu0 %516 }
 0x20d   : > { %839 = vlog2.f32 %v517_v5 }
 0x20e   : > { %v830_v6 = vpop.eup %829 }
 0x20f   : > { %v832_v7 = vpop.eup %831  ;;  %v535_v8 = vmul.f32 0.6931472, %v830_v6  ;;  %v529_v9 = vpop.xlane.xlu1 %528 }
 0x210   : > { %v531_v10 = vmul.f32 0.6931472, %v832_v7  ;;  %841 = vlog2.f32 %v529_v9  ;;  %v527_v11 = vpop.xlane.xlu0 %526 }
 0x211   : > { %557 = vst.msk [vmem:[%s200_s12 + $0x10] sm:$0xff] %vm554_vm1, %v535_v8  ;;  %843 = vlog2.f32 %v527_v11 }
 0x212   : > { %v834_v12 = vpop.eup %833  ;;  %555 = vst.msk [vmem:[%s200_s12] sm:$0xff] %vm554_vm1, %v531_v10 }
 0x213   : > { %v836_v13 = vpop.eup %835  ;;  %v537_v14 = vmul.f32 0.6931472, %v834_v12 }
 0x214   : > { %v539_v15 = vmul.f32 0.6931472, %v836_v13 }
 0x215   : > { %558 = vst.msk [vmem:[%s200_s12 + $0x18] sm:$0xff] %vm554_vm1, %v537_v14 }
 0x216   : > { %v838_v16 = vpop.eup %837  ;;  %559 = vst.msk [vmem:[%s200_s12 + $0x20] sm:$0xff] %vm554_vm1, %v539_v15 }
 0x217   : > { %v840_v17 = vpop.eup %839  ;;  %v541_v18 = vmul.f32 0.6931472, %v838_v16 }
 0x218   : > { %v533_v19 = vmul.f32 0.6931472, %v840_v17 }
 0x219   : > { %560 = vst.msk [vmem:[%s200_s12 + $0x28] sm:$0xff] %vm554_vm1, %v541_v18 }
 0x21a   : > { %v842_v20 = vpop.eup %841  ;;  %556 = vst.msk [vmem:[%s200_s12 + $0x8] sm:$0xff] %vm554_vm1, %v533_v19 }
 0x21b   : > { %v844_v21 = vpop.eup %843  ;;  %v545_v22 = vmul.f32 0.6931472, %v842_v20 }
 0x21c   : > { %v543_v23 = vmul.f32 0.6931472, %v844_v21 }
 0x21d   : > { %562 = vst.msk [vmem:[%s200_s12 + $0x38] sm:$0xff] %vm554_vm1, %v545_v22 }
 0x21e   : > { %561 = vst.msk [vmem:[%s200_s12 + $0x30] sm:$0xff] %vm554_vm1, %v543_v23 }
 0x21f PF: > { %s16_s14 = sadd.s32 1, %s957_s14   ;;  %s1187_s9 = smov %s941_s10 }
 0x220   : > { %p13_p1 = scmp.ge.s32.totalorder %s16_s14, 4   ;;  %s1188_s10 = smov %s945_s11 }
 0x221   : > { %s1189_s11 = smov %s1064_s21  ;;  %s1190_s12 = smov %s953_s13 }
 0x222   : > { %s1191_s13 = smov %s1193_s22  ;;  %15 = sbr.rel (!%p13_p1) target bundleno = 5 (0x5), region = 89 }
 0x229   :  { %585 = vsyncpa [#allocation4], 1 }
 0x22a   :  { %587 = vsyncpa [#allocation4 + $0x1], 1 }
 0x22b   :  { %588 = vsyncpa [#allocation6], 1 }

</bundles_post_ra>
